<compile_context>
chip_gen: v7x
topology: tpu7x:2x2x1
jax: 0.10.0
libtpu: 0.0.40
codegen_flags: <defaults>
</compile_context>

<pallas_src>
import jax
import jax.numpy as jnp
from jax.experimental import pallas as pl
from jax.experimental.pallas import tpu as pltpu

_LANE = 128
_SUBLANE = 8


def _round_up(x, m):
    return (x + m - 1) // m * m


def _cdiv(a, b):
    return (a + b - 1) // b


def _patch_embed_kernel(x_ref, w_ref, b_ref, o_ref):
    # x_ref: (TM, K)  tile of flattened patches (compute dtype)
    # w_ref: (K, TE)  tile of the reshaped conv weight (compute dtype)
    # b_ref: (1, TE)  bias tile, already f32
    # o_ref: (TM, TE) output tile
    acc = jnp.dot(x_ref[...], w_ref[...], preferred_element_type=jnp.float32)
    o_ref[...] = (acc + b_ref[...]).astype(o_ref.dtype)


def _vmem_budget():
    """Generation-aware (tile budget, scoped vmem limit) in bytes."""
    try:
        cap = int(pltpu.get_tpu_info().vmem_capacity_bytes)
    except Exception:  # conservative fallback if the HW query is unavailable
        cap = 64 * 1024 * 1024
    if cap >= 100 * 1024 * 1024:   # v5e / v6e: 128 MiB VMEM per TensorCore
        return 32 << 20, 64 << 20
    # v7x (64 MiB per TensorCore, both cores active under megacore) or unknown:
    # keep the per-core footprint well under the 32 MiB scoped limit.
    return 12 << 20, 32 << 20


def _largest_aligned_divisor(n, align, cap):
    """Largest d with d % align == 0, d | n, d <= cap; None if there is none."""
    best, d = None, align
    top = min(n, cap)
    while d <= top:
        if n % d == 0:
            best = d
        d += align
    return best


def _choose_tiles(M, K, Ep, in_item, out_item, row_align):
    budget, vmem_limit = _vmem_budget()

    # --- E (output-column) tile: bound the resident weight slab. -------------
    TE = Ep
    if 2 * K * TE * in_item > budget // 2:          # double-buffered weight too big
        te_cap = max((budget // 2) // (2 * K * in_item), _LANE)
        te_cap = max((te_cap // _LANE) * _LANE, _LANE)
        TE = _largest_aligned_divisor(Ep, _LANE, te_cap) or _LANE

    # --- M (row) tile from the remaining budget. ------------------------------
    fixed = 2 * K * TE * in_item + 2 * TE * 4            # weight + f32 bias buffers
    per_row = 2 * K * in_item + 2 * TE * out_item        # double-buffered x + out tiles
    tm = max((budget - fixed) // per_row, row_align)
    tm = min(tm, 1024)                                   # roofline saturates ~512-1024
    tm = min(tm, _round_up(_cdiv(M, 8), _LANE))          # keep >= ~8 grid steps
    Ma = _round_up(M, row_align)
    tm = min(tm, Ma)                                     # don't pad tiny M to a huge tile
    if tm >= _LANE:
        tm = (tm // _LANE) * _LANE
    else:
        tm = max((tm // row_align) * row_align, row_align)
    # Prefer a tile that divides the row-aligned M exactly -> no M-padding copy.
    div = _largest_aligned_divisor(Ma, row_align, tm)
    if div is not None and div >= min(tm, max(_LANE, tm // 2)):
        tm = div
    return int(tm), int(TE), int(vmem_limit)


def patch_embed(x, weight, bias, patch_size, *, compute_dtype=None, out_dtype=None):
    """x: (B, C, H, W); weight: (E, C, ph, pw); bias: (E,) -> (B, nP, E).

    compute_dtype: MXU operand dtype. Default: bf16 when x is f32 (f32
      accumulation kept), else x.dtype. Pass jnp.float32 for full precision.
    out_dtype: output dtype (default x.dtype; bf16 halves writeback traffic).
    """
    B, C, H, W = x.shape
    E = weight.shape[0]
    ph, pw = patch_size
    assert H % ph == 0 and W % pw == 0, "Image dims must be divisible by patch size"
    nh, nw = H // ph, W // pw
    n_patches = nh * nw

    out_dtype = jnp.dtype(out_dtype) if out_dtype is not None else jnp.dtype(x.dtype)
    if compute_dtype is None:
        compute_dtype = jnp.bfloat16 if jnp.dtype(x.dtype) == jnp.float32 else x.dtype
    compute_dtype = jnp.dtype(compute_dtype)

    K = C * ph * pw

    # im2col glue in XLA: cast to the (narrower) compute dtype BEFORE the
    # transpose so the relayout copy moves half the bytes. Patch vector ordered
    # (c, dh, dw) to match the Conv2d weight layout (E, C, ph, pw).
    xc = x.astype(compute_dtype)
    xp = xc.reshape(B, C, nh, ph, nw, pw)
    xp = jnp.transpose(xp, (0, 2, 4, 1, 3, 5))        # (B, nh, nw, C, ph, pw)
    xp = xp.reshape(B * n_patches, K)                 # (M, K)
    M = xp.shape[0]

    w2 = weight.reshape(E, K).T.astype(compute_dtype)  # (K, E), same dtype as xp

    # Lane-dense output columns: pad E to a multiple of 128 (no-op for 768/1024/...).
    Ep = _round_up(E, _LANE)
    if Ep != E:
        w2 = jnp.pad(w2, ((0, 0), (0, Ep - E)))
        b2 = jnp.pad(bias, (0, Ep - E))
    else:
        b2 = bias
    b2 = b2.reshape(1, Ep).astype(jnp.float32)          # pre-cast once, stays resident

    in_item = jnp.dtype(compute_dtype).itemsize
    out_item = jnp.dtype(out_dtype).itemsize
    row_align = 16 if min(in_item, out_item) < 4 else _SUBLANE  # bf16 native (16,128)
    TM, TE, vmem_limit = _choose_tiles(M, K, Ep, in_item, out_item, row_align)

    Mp = _round_up(M, TM)
    if Mp != M:   # rare: TM is usually chosen to divide the row-aligned M
        xp = jnp.pad(xp, ((0, Mp - M), (0, 0)))

    grid = (Mp // TM, Ep // TE)

    out_padded = pl.pallas_call(
        _patch_embed_kernel,
        out_shape=jax.ShapeDtypeStruct((Mp, Ep), out_dtype),
        grid_spec=pl.GridSpec(
            grid=grid,
            in_specs=[
                pl.BlockSpec((TM, K), lambda i, j: (i, 0)),   # streamed patch tiles
                pl.BlockSpec((K, TE), lambda i, j: (0, j)),   # weight (resident when TE==Ep)
                pl.BlockSpec((1, TE), lambda i, j: (0, j)),   # f32 bias
            ],
            out_specs=pl.BlockSpec((TM, TE), lambda i, j: (i, j)),
        ),
        compiler_params=pltpu.CompilerParams(
            dimension_semantics=("parallel", "parallel"),     # megacore on v7x
            vmem_limit_bytes=vmem_limit,
        ),
    )(xp, w2, b2)

    out = out_padded
    if Mp != M:
        out = out[:M]
    if Ep != E:
        out = out[:, :E]
    return out.reshape(B, n_patches, E)


if __name__ == "__main__":
    # Small shapes consistent with the module.
    B, C, H, W = 2, 4, 16, 16
    patch_size = (8, 8)
    embed_dim = 32

    key = jax.random.PRNGKey(0)
    kx, kw, kb = jax.random.split(key, 3)

    x = jax.random.normal(kx, (B, C, H, W), dtype=jnp.float32)
    weight = jax.random.normal(
        kw, (embed_dim, C, patch_size[0], patch_size[1]), dtype=jnp.float32) * 0.02
    bias = jax.random.normal(kb, (embed_dim,), dtype=jnp.float32) * 0.02

    # Reference: the same conv in pure JAX.
    ref = jax.lax.conv_general_dilated(
        x, weight, window_strides=patch_size, padding="VALID",
        dimension_numbers=("NCHW", "OIHW", "NCHW"))
    ref = ref + bias.reshape(1, -1, 1, 1)
    nP = (H // patch_size[0]) * (W // patch_size[1])
    ref = ref.reshape(B, embed_dim, nP).transpose(0, 2, 1)

    # Full-precision operand path (tight tolerance).
    out_f32 = patch_embed(x, weight, bias, patch_size, compute_dtype=jnp.float32)
    jax.block_until_ready(out_f32)
    assert out_f32.shape == (B, nP, embed_dim)
    assert out_f32.dtype == x.dtype
    assert jnp.allclose(out_f32, ref, atol=1e-4, rtol=1e-4)

    # Default path: bf16 MXU operands, f32 accumulation, f32 output.
    out_def = patch_embed(x, weight, bias, patch_size)
    jax.block_until_ready(out_def)
    assert out_def.shape == (B, nP, embed_dim)
    assert out_def.dtype == x.dtype
    assert jnp.allclose(out_def, ref, atol=2e-2, rtol=2e-2)

    # bf16 output option (halves writeback traffic), looser tolerance.
    out_bf16 = patch_embed(x, weight, bias, patch_size, out_dtype=jnp.bfloat16)
    jax.block_until_ready(out_bf16)
    assert out_bf16.shape == (B, nP, embed_dim)
    assert out_bf16.dtype == jnp.bfloat16
    assert jnp.allclose(out_bf16.astype(jnp.float32), ref, atol=5e-2, rtol=5e-2)

    print("KERNEL_OK")
</pallas_src>

<mosaic_0001>
module attributes {stable_mosaic.version = 11 : i64} {
  func.func @_patch_embed_kernel(%arg0: i32, %arg1: i32, %arg2: memref<8x256xf32, #tpu.memory_space<vmem>>, %arg3: memref<256x128xf32, #tpu.memory_space<vmem>>, %arg4: memref<1x128xf32, #tpu.memory_space<vmem>>, %arg5: memref<8x128xf32, #tpu.memory_space<vmem>>) attributes {dimension_semantics = [#tpu.dimension_semantics<parallel>, #tpu.dimension_semantics<parallel>], iteration_bounds = array<i64: 1, 1>, scalar_prefetch = 0 : i64, scratch_operands = 0 : i64, tpu.core_type = #tpu.core_type<tc>, window_params = [{transform_indices = @transform_0, window_bounds = array<i64: 8, 256>}, {transform_indices = @transform_1, window_bounds = array<i64: 256, 128>}, {transform_indices = @transform_2, window_bounds = array<i64: 1, 128>}, {transform_indices = @transform_3, window_bounds = array<i64: 8, 128>}]} {
    %c0 = arith.constant 0 : index
    %c0_0 = arith.constant 0 : index
    %0 = vector.load %arg2[%c0, %c0_0] : memref<8x256xf32, #tpu.memory_space<vmem>>, vector<8x256xf32>
    %c0_1 = arith.constant 0 : index
    %c0_2 = arith.constant 0 : index
    %1 = vector.load %arg3[%c0_1, %c0_2] : memref<256x128xf32, #tpu.memory_space<vmem>>, vector<256x128xf32>
    %cst = arith.constant dense<0.000000e+00> : vector<8x128xf32>
    %2 = tpu.matmul %0, %1, %cst {dimension_numbers = #tpu.dot_dimension_numbers<[1], [0], [0], [1], [0, 0, 1, 1], [], []>} : vector<8x256xf32>, vector<256x128xf32>, vector<8x128xf32> -> vector<8x128xf32>
    %c0_3 = arith.constant 0 : index
    %c0_4 = arith.constant 0 : index
    %3 = vector.load %arg4[%c0_3, %c0_4] : memref<1x128xf32, #tpu.memory_space<vmem>>, vector<1x128xf32>
    %4 = vector.broadcast %3 : vector<1x128xf32> to vector<8x128xf32>
    %5 = arith.addf %2, %4 : vector<8x128xf32>
    %c0_5 = arith.constant 0 : index
    %c0_6 = arith.constant 0 : index
    %6 = vector.load %arg5[%c0_5, %c0_6] : memref<8x128xf32, #tpu.memory_space<vmem>>, vector<8x128xf32>
    tpu.vector_store %arg5[%c0_5, %c0_6], %5 {strides = array<i32>} : memref<8x128xf32, #tpu.memory_space<vmem>>, vector<8x128xf32>,
    return
  }
  func.func @transform_0(%arg0: i32, %arg1: i32) -> (i32, i32) {
    %c0_i32 = arith.constant 0 : i32
    %c0_i32_0 = arith.constant 0 : i32
    return %arg0, %c0_i32 : i32, i32
  }
  func.func @transform_1(%arg0: i32, %arg1: i32) -> (i32, i32) {
    %c0_i32 = arith.constant 0 : i32
    %c0_i32_0 = arith.constant 0 : i32
    return %c0_i32, %arg1 : i32, i32
  }
  func.func @transform_2(%arg0: i32, %arg1: i32) -> (i32, i32) {
    %c0_i32 = arith.constant 0 : i32
    %c0_i32_0 = arith.constant 0 : i32
    return %c0_i32, %arg1 : i32, i32
  }
  func.func @transform_3(%arg0: i32, %arg1: i32) -> (i32, i32) {
    %c0_i32 = arith.constant 0 : i32
    return %arg0, %arg1 : i32, i32
  }
}

</mosaic_0001>

<bundles_post_ra>
// kernel: tpu_custom_call.1
= control target key start
LH: loop header
LB: loop body
LE: loop exit
PB: predicated region body
PF: predicated region fallthrough
CT: control target
= control target key end

     0   :  { %8 = vsyncpa [#allocation3], 0  ;;  %s385_s0 = inlined_call_operand.hbm [shape: f32[8,256], index: 0, kind: input, shape index: {}]   ;;  %s386_s1 = inlined_call_operand.hbm [shape: f32[256,128], index: 1, kind: input, shape index: {}]   ;;  %s387_s2 = inlined_call_operand.vmem [shape: f32[1,128], index: 2, kind: input, shape index: {}]   ;;  %s388_s3 = inlined_call_operand.hbm [shape: f32[8,128], index: 3, kind: output, shape index: {}]  }
   0x1   :  { %9 = vsyncpa [#allocation6], 0 }
   0x2   :  { %10 = vsyncpa [#allocation4], 0  ;;  %s314_s12 = smov [#allocation2]   ;;  %s315_s14 = smov [#allocation5]  }
   0x3   :  { %s17_s13 = sshll.u32 %s314_s12, 4  ;;  %s26_s15 = sshll.u32 %s315_s14, 4  ;;  %s18_s13 = int_to_ptr.vmem [resolvable:$true] %s17_s13  ;;  %s339_s15 = int_to_ptr.vmem [resolvable:$true] %s26_s15 }
   0x4   :  { %s242_s18 = scalar_lea.hbm %s385_s0, 256 }
   0x5   :  { %p243_p0 = scmp.ne.s32.totalorder %s385_s0, %s242_s18  ;;  %p246_p1 = scmp.lt.u32.totalorder %s242_s18, %s385_s0 }
   0x7   :  { %p248_p2 = pnand %p246_p1, %p243_p0 }
   0x9   :  { %251 = shalt.err (!%p248_p2)
}
   0xa   :  { %s252_s23 = scalar_lea.vmem %s18_s13, 256  ;;  %p257_p4 = scmp.lt.s32.totalorder %s18_s13, %s18_s13 }
   0xb   :  { %p253_p3 = scmp.ne.s32.totalorder %s18_s13, %s252_s23  ;;  %p258_p5 = scmp.lt.s32.totalorder %s252_s23, %s252_s23 }
   0xd   :  { %p259_p6 = por %p258_p5, %p257_p4 }
   0xf   :  { %p260_p7 = pnand %p259_p6, %p253_p3 }
  0x11   :  { %263 = shalt.err (!%p260_p7)
}
  0x12   :  { %20 = dma.hbm_to_vmem [thread:$0]  %s385_s0, 256, %s18_s13, [#allocation3]  }
  0x13   :  { %s264_s28 = scalar_lea.hbm %s386_s1, 4096 }
  0x14   :  { %p265_p8 = scmp.ne.s32.totalorder %s386_s1, %s264_s28  ;;  %p268_p9 = scmp.lt.u32.totalorder %s264_s28, %s386_s1 }
  0x16   :  { %p270_p10 = pnand %p268_p9, %p265_p8 }
  0x18   :  { %273 = shalt.err (!%p270_p10)
}
  0x19   :  { %s274_s6 = scalar_lea.vmem %s339_s15, 4096  ;;  %p279_p12 = scmp.lt.s32.totalorder %s339_s15, %s339_s15 }
  0x1a   :  { %p275_p11 = scmp.ne.s32.totalorder %s339_s15, %s274_s6  ;;  %p280_p13 = scmp.lt.s32.totalorder %s274_s6, %s274_s6 }
  0x1c   :  { %p281_p0 = por %p280_p13, %p279_p12 }
  0x1e   :  { %p282_p1 = pnand %p281_p0, %p275_p11 }
  0x20   :  { %285 = shalt.err (!%p282_p1)
}
  0x21   :  { %s316_s0 = smov 128   ;;  %s317_s7 = smov 8  }
  0x22   :  { %32 = dma.hbm_to_vmem [thread:$0]  %s386_s1, 4096, %s339_s15, [#allocation6], %s316_s0, %s316_s0, %s317_s7  }
  0x23   :  { %308 = dma.done.wait [#allocation3], 256  }
  0x24   :  { %309 = vsyncadd [#allocation3], 4294967040 }
  0x25   :  { %310 = dma.done.wait [#allocation6], 4096  }
  0x26   :  { %311 = vsyncadd [#allocation6], 4294963200  ;;  %v59_v0 = vld [vmem:[#allocation5 + $0x80] sm:$0xff]  ;;  %v60_v1 = vld [vmem:[#allocation5 + $0x88] sm:$0xff]  ;;  %s318_s11 = smov [#allocation7]  }
  0x27   :  { %v43_v2 = vld [vmem:[#allocation5] sm:$0xff]  ;;  %v205_v3 = vpack.c.bf16 %v60_v1, %v59_v0  ;;  %v44_v4 = vld [vmem:[#allocation5 + $0x8] sm:$0xff]  ;;  %v61_v5 = vld [vmem:[#allocation5 + $0x90] sm:$0xff]  ;;  %s159_s12 = sshll.u32 %s318_s11, 4  ;;  %s160_s12 = int_to_ptr.vmem [resolvable:$true] %s159_s12 }
  0x28   :  { %v62_v6 = vld [vmem:[#allocation5 + $0x98] sm:$0xff]  ;;  %v207_v7 = vpack.c.bf16 %v44_v4, %v43_v2  ;;  %v45_v9 = vld [vmem:[#allocation5 + $0x10] sm:$0xff]  ;;  %v63_v11 = vld [vmem:[#allocation5 + $0xa0] sm:$0xff]  ;;  %s286_s13 = scalar_lea.vmem %s160_s12, 128  ;;  %p291_p3 = scmp.lt.s32.totalorder %s160_s12, %s160_s12 }
  0x29   :  { %v209_v8 = vpack.c.bf16 %v62_v6, %v61_v5  ;;  %v46_v10 = vld [vmem:[#allocation5 + $0x18] sm:$0xff]  ;;  %206 = vmatprep.subr.bf16.mxu0 %v205_v3  ;;  %v64_v12 = vld [vmem:[#allocation5 + $0xa8] sm:$0xff]  ;;  %v47_v15 = vld [vmem:[#allocation5 + $0x20] sm:$0xff]  ;;  %p287_p2 = scmp.ne.s32.totalorder %s160_s12, %s286_s13  ;;  %p292_p4 = scmp.lt.s32.totalorder %s286_s13, %s286_s13 }
  0x2a   :  { %208 = vmatpush3.bf16.msra.mxu0 %v207_v7  ;;  %v211_v13 = vpack.c.bf16 %v46_v10, %v45_v9  ;;  %v213_v14 = vpack.c.bf16 %v64_v12, %v63_v11  ;;  %v48_v16 = vld [vmem:[#allocation5 + $0x28] sm:$0xff]  ;;  %v65_v17 = vld [vmem:[#allocation5 + $0xb0] sm:$0xff]  ;;  %v66_v18 = vld [vmem:[#allocation5 + $0xb8] sm:$0xff] }
  0x2b   :  { %210 = vmatprep.subr.bf16.mxu0 %v209_v8  ;;  %v215_v19 = vpack.c.bf16 %v48_v16, %v47_v15  ;;  %v217_v20 = vpack.c.bf16 %v66_v18, %v65_v17  ;;  %v49_v21 = vld [vmem:[#allocation5 + $0x30] sm:$0xff]  ;;  %v50_v22 = vld [vmem:[#allocation5 + $0x38] sm:$0xff]  ;;  %v67_v23 = vld [vmem:[#allocation5 + $0xc0] sm:$0xff]  ;;  %p293_p5 = por %p292_p4, %p291_p3 }
  0x2c   :  { %v68_v24 = vld [vmem:[#allocation5 + $0xc8] sm:$0xff]  ;;  %v42_v25 = vld [vmem:[#allocation2 + $0x8] sm:$0xff]  ;;  %v219_v26 = vpack.c.bf16 %v50_v22, %v49_v21  ;;  %v51_v28 = vld [vmem:[#allocation5 + $0x40] sm:$0xff] }
  0x2d   :  { %146 = vmatprep.mubr.f32.mxu0 %v42_v25  ;;  %v221_v27 = vpack.c.bf16 %v68_v24, %v67_v23  ;;  %v52_v29 = vld [vmem:[#allocation5 + $0x48] sm:$0xff]  ;;  %v69_v30 = vld [vmem:[#allocation5 + $0xd0] sm:$0xff]  ;;  %v70_v31 = vld [vmem:[#allocation5 + $0xd8] sm:$0xff]  ;;  %p294_p6 = pnand %p293_p5, %p287_p2 }
  0x2e   :  { %212 = vmatpush3.bf16.msra.mxu0 %v211_v13  ;;  %v223_v32 = vpack.c.bf16 %v52_v29, %v51_v28  ;;  %v225_v33 = vpack.c.bf16 %v70_v31, %v69_v30  ;;  %v53_v34 = vld [vmem:[#allocation5 + $0x50] sm:$0xff]  ;;  %v54_v35 = vld [vmem:[#allocation5 + $0x58] sm:$0xff]  ;;  %v71_v36 = vld [vmem:[#allocation5 + $0xe0] sm:$0xff] }
  0x2f   :  { %214 = vmatprep.subr.bf16.mxu0 %v213_v14  ;;  %v72_v37 = vld [vmem:[#allocation5 + $0xe8] sm:$0xff]  ;;  %v227_v38 = vpack.c.bf16 %v54_v35, %v53_v34  ;;  %v55_v40 = vld [vmem:[#allocation5 + $0x60] sm:$0xff]  ;;  %v73_v42 = vld [vmem:[#allocation5 + $0xf0] sm:$0xff] }
  0x30   :  { %v229_v39 = vpack.c.bf16 %v72_v37, %v71_v36  ;;  %v56_v41 = vld [vmem:[#allocation5 + $0x68] sm:$0xff]  ;;  %v74_v43 = vld [vmem:[#allocation5 + $0xf8] sm:$0xff]  ;;  %v57_v46 = vld [vmem:[#allocation5 + $0x70] sm:$0xff] }
  0x31   :  { %v231_v44 = vpack.c.bf16 %v56_v41, %v55_v40  ;;  %v233_v45 = vpack.c.bf16 %v74_v43, %v73_v42  ;;  %v58_v47 = vld [vmem:[#allocation5 + $0x78] sm:$0xff]  ;;  %v41_v49 = vld [vmem:[#allocation2] sm:$0xff] }
  0x32   :  { %216 = vmatpush3.bf16.msra.mxu0 %v215_v19  ;;  %v235_v48 = vpack.c.bf16 %v58_v47, %v57_v46  ;;  %v169_v51 = vld [vmem:[%s387_s2] ss:$0 sm:$0xff] }
  0x33   :  { %218 = vmatprep.subr.bf16.mxu0 %v217_v20 }
  0x36   :  { %220 = vmatpush3.bf16.msra.mxu0 %v219_v26 }
  0x37   :  { %222 = vmatprep.subr.bf16.mxu0 %v221_v27 }
  0x3a   :  { %224 = vmatpush3.bf16.msra.mxu0 %v223_v32 }
  0x3b   :  { %226 = vmatprep.subr.bf16.mxu0 %v225_v33 }
  0x3e   :  { %228 = vmatpush3.bf16.msra.mxu0 %v227_v38 }
  0x3f   :  { %230 = vmatprep.subr.bf16.mxu0 %v229_v39 }
  0x42   :  { %232 = vmatpush3.bf16.msra.mxu0 %v231_v44 }
  0x43   :  { %234 = vmatprep.subr.bf16.mxu0 %v233_v45 }
  0x46   :  { %236 = vmatpush3.bf16.msra.mxu0 %v235_v48 }
  0x49   :  { %147 = vmatmul.mubr.f32.vlgmr.msra.gmra.mrb[0].mxu0 %v41_v49 }
 0x11c   :  { %v202_v50 = vpop.f32.mrb[0].mxu0 }
 0x11d   :  { %v203_v52 = vpop.f32.mrb[1].mxu0 }
 0x11e   :  { %v204_v53 = vadd.f32 %v203_v52, %v202_v50 }
 0x120   :  { %v149_v54 = vadd.f32 %v204_v53, %v169_v51 }
 0x122   :  { %152 = vst [vmem:[#allocation7] sm:$0xff] %v149_v54 }
 0x123   :  { %297 = shalt.err (!%p294_p6)
}
 0x124   :  { %s298_s16 = scalar_lea.hbm %s388_s3, 128 }
 0x125   :  { %p299_p7 = scmp.ne.s32.totalorder %s388_s3, %s298_s16  ;;  %p302_p8 = scmp.lt.u32.totalorder %s298_s16, %s388_s3 }
 0x127   :  { %p304_p9 = pnand %p302_p8, %p299_p7 }
 0x129   :  { %307 = shalt.err (!%p304_p9)
}
 0x12a   :  { %162 = dma.vmem_to_hbm [thread:$0]  %s160_s12, 128, %s388_s3, [#allocation4]  }
 0x12b   :  { %312 = dma.done.wait [#allocation4], 128  }
 0x12c   :  { %313 = vsyncadd [#allocation4], 4294967168 }
 0x12d   :  { %166 = vsyncpa [#allocation3], 1 }
 0x12e   :  { %167 = vsyncpa [#allocation6], 1 }
 0x12f   :  { %168 = vsyncpa [#allocation4], 1 }

</bundles_post_ra>
